<compile_context>
chip_gen: v7x
topology: tpu7x:2x2x1
jax: 0.10.0
libtpu: 0.0.40
codegen_flags: <defaults>
</compile_context>

<pallas_src>
import functools

import jax
import jax.numpy as jnp
from jax.experimental import pallas as pl
from jax.experimental.pallas import tpu as pltpu

LANE = 128


def nsp_kernel(x_ref, w_ref, b_ref, o_ref, acc_ref, *, inv_seq_len, mxu_reduce):
    # x_ref: (TB, TS, H); w_ref: (H, C_pad); b_ref: (1, C_pad)
    # o_ref: (TB, C_pad)
    # acc_ref: (TB, C_pad) f32 when mxu_reduce else (TB, H) f32.
    s = pl.program_id(1)

    @pl.when(s == 0)
    def _():
        acc_ref[...] = jnp.zeros_like(acc_ref)

    if mxu_reduce:
        # Offload the seq reduction to the MXU:
        #   (sum_s x_s) @ W == sum_s (x_s @ W)  (bias applied once at the end).
        xt = x_ref[...]
        if xt.dtype != w_ref.dtype:
            xt = xt.astype(w_ref.dtype)
        tb, ts, h = xt.shape
        c_pad = w_ref.shape[1]
        proj = jnp.dot(xt.reshape(tb * ts, h), w_ref[...],
                       preferred_element_type=jnp.float32)       # (TB*TS, C_pad)
        acc_ref[...] += jnp.sum(proj.reshape(tb, ts, c_pad), axis=1)
    else:
        # VPU partial sum over this seq tile; the cast fuses into the f32
        # accumulation (no full-precision temp of the whole tile).
        acc_ref[...] += jnp.sum(x_ref[...], axis=1, dtype=jnp.float32)

    @pl.when(s == pl.num_programs(1) - 1)
    def _():
        if mxu_reduce:
            out = acc_ref[...] * inv_seq_len + b_ref[...].astype(jnp.float32)
        else:
            mean = acc_ref[...] * inv_seq_len                     # (TB, H) f32
            # NOTE: feeding the MXU in the weight dtype deliberately downcasts
            # the mean when weights are bf16 (fine for a classification head).
            out = jnp.dot(mean.astype(w_ref.dtype), w_ref[...],
                          preferred_element_type=jnp.float32)     # (TB, C_pad)
            out = out + b_ref[...].astype(jnp.float32)
        o_ref[...] = out.astype(o_ref.dtype)


def _vmem_capacity_bytes():
    """Physical VMEM per TensorCore (v5e/v6e: 128 MiB, v7x: 64 MiB)."""
    try:
        cap = getattr(pltpu.get_tpu_info(), "vmem_capacity_bytes", None)
        if cap:
            return int(cap)
    except Exception:
        pass
    return 64 * 1024 * 1024  # conservative fallback == v7x per-core VMEM


def _choose_tile(full, cap, align):
    """Largest multiple of `align` dividing `full` and <= cap; falls back to the
    largest 8-aligned divisor <= cap, then to `full` (block == full dim is legal)."""
    cap = max(min(cap, full), 1)
    best = None
    for t in range(align, cap + 1, align):
        if full % t == 0:
            best = t
    if best is not None:
        return best
    for t in range(cap, 0, -1):
        if full % t == 0 and (t % 8 == 0 or t == full):
            return t
    return full


def prepare_nsp_params(weight, bias, *, weight_dtype=None):
    """One-time param prep OUTSIDE the hot path: transpose PyTorch-layout (C, H)
    -> (H, C_pad), pad the class dim to a multiple of 128 lanes, and optionally
    cast weights (e.g. to bf16 so the MXU pass is single-pass on v5e)."""
    C, H = weight.shape
    if weight_dtype is not None:
        weight = weight.astype(weight_dtype)
    c_pad = ((C + LANE - 1) // LANE) * LANE
    w_t = jnp.zeros((H, c_pad), weight.dtype).at[:, :C].set(weight.T)
    b2d = jnp.zeros((1, c_pad), bias.dtype).at[0, :C].set(bias)
    return w_t, b2d, C


def next_sentence_prediction(x, w_t, b2d, n_classes, *, tb=None, ts=None,
                             use_mxu_reduce=None, vmem_limit_bytes=None):
    """x: (B, S, H); w_t: (H, C_pad) pre-transposed/padded weight; b2d: (1, C_pad).
    Returns (B, n_classes) f32  ==  mean(x, dim=1) @ W.T + b."""
    B, S, H = x.shape
    c_pad = w_t.shape[1]
    itemsize = jnp.dtype(x.dtype).itemsize

    # MXU-offloaded seq reduction for small class counts (keeps v7x HBM-bound
    # instead of VALU-bound); VPU sum + single epilogue matmul otherwise.
    if use_mxu_reduce is None:
        use_mxu_reduce = c_pad <= 256
    acc_cols = c_pad if use_mxu_reduce else H

    # VMEM-aware planning: explicit budget derived from the real capacity.
    vmem_cap = _vmem_capacity_bytes()
    if vmem_limit_bytes is None:
        vmem_limit_bytes = min(int(vmem_cap * 3 // 4), 100 * 1024 * 1024)

    # Sublane packing alignment for the (ts, H) x block: f32->8, bf16->16, int8->32.
    ts_align = max(8, 32 // itemsize)

    if tb is None:
        tb_cap = min(B, 128)
        if B >= 16:
            tb_cap = min(tb_cap, B // 2)   # keep >=2 batch tiles for megacore
        tb = _choose_tile(B, tb_cap, 8)

    def _plan_bytes(ts_):
        x_stream = 2 * tb * ts_ * H * itemsize          # double-buffered x tiles
        out_bufs = 2 * tb * c_pad * 4                   # double-buffered f32 out
        acc = tb * acc_cols * 4                         # scratch accumulator
        consts = 2 * (int(w_t.nbytes) + int(b2d.nbytes))  # worst case: 2 buffers
        return x_stream + out_bufs + acc + consts

    if ts is None:
        x_budget = int(vmem_limit_bytes * 0.6)
        ts_cap = max(ts_align, x_budget // max(1, 2 * tb * H * itemsize))
        ts = _choose_tile(S, ts_cap, ts_align)
        while _plan_bytes(ts) > vmem_limit_bytes:
            new_ts = _choose_tile(S, max(ts_align, ts // 2), ts_align)
            if new_ts >= ts:
                break
            ts = new_ts

    # Correctness guards: no silently dropped rows/positions, no illegal blocks.
    if B % tb or S % ts:
        raise ValueError(f"tile sizes must divide dims: B={B} tb={tb}, S={S} ts={ts}")
    if (tb % 8 and tb != B) or (ts % 8 and ts != S):
        raise ValueError(f"tiles must be 8-aligned or full: tb={tb}, ts={ts}")

    grid = (B // tb, S // ts)
    kernel = functools.partial(nsp_kernel, inv_seq_len=1.0 / S,
                               mxu_reduce=use_mxu_reduce)

    if use_mxu_reduce:
        flops = 2 * B * S * H * c_pad + B * S * c_pad
    else:
        flops = B * S * H + 2 * B * H * c_pad
    cost = pl.CostEstimate(
        flops=flops, transcendentals=0,
        bytes_accessed=int(x.nbytes) + int(w_t.nbytes) + int(b2d.nbytes)
        + B * c_pad * 4)

    def _build(single_buffer_consts):
        const_kwargs = {}
        if single_buffer_consts:
            # Constant-index operands never change block: one buffer is enough.
            const_kwargs = dict(pipeline_mode=pl.Buffered(1))
        return pl.pallas_call(
            kernel,
            out_shape=jax.ShapeDtypeStruct((B, c_pad), jnp.float32),
            grid_spec=pltpu.PrefetchScalarGridSpec(
                num_scalar_prefetch=0,
                grid=grid,
                in_specs=[
                    # x tile streams over (batch, seq); H kept whole.
                    pl.BlockSpec((tb, ts, H), lambda b, s: (b, s, 0)),
                    # Weight / bias: constant index_map -> VMEM-resident across S.
                    pl.BlockSpec((H, c_pad), lambda b, s: (0, 0), **const_kwargs),
                    pl.BlockSpec((1, c_pad), lambda b, s: (0, 0), **const_kwargs),
                ],
                # Same output block across the seq axis: accumulator-resident,
                # written once on the final seq step. Lane-dense (C_pad % 128 == 0).
                out_specs=pl.BlockSpec((tb, c_pad), lambda b, s: (b, 0)),
                scratch_shapes=[pltpu.VMEM((tb, acc_cols), jnp.float32)],
            ),
            compiler_params=pltpu.CompilerParams(
                dimension_semantics=("parallel", "arbitrary"),
                vmem_limit_bytes=vmem_limit_bytes),
            cost_estimate=cost,
        )

    try:
        out_padded = _build(True)(x, w_t, b2d)
    except Exception:
        # TODO(synk): pipeline_mode=pl.Buffered(1) is a pure VMEM saving on the
        # resident weight/bias; fall back to default double-buffering if the
        # installed jax/Mosaic version does not support it.
        out_padded = _build(False)(x, w_t, b2d)

    return out_padded[:, :n_classes]


if __name__ == "__main__":
    # Small shapes consistent with BERTLM.forward -> NextSentencePrediction:
    #   x: [batch, seq, hidden] (BERT last hidden states); Linear hidden -> hashtag_size.
    batch, seq, hidden = 16, 32, 128
    hashtag_size = 16

    key = jax.random.PRNGKey(0)
    kx, kw, kb = jax.random.split(key, 3)

    x = jax.random.normal(kx, (batch, seq, hidden), dtype=jnp.float32)

    # Deterministic xavier_normal_-style init for the linear weight
    # (fan_in=hidden, fan_out=hashtag_size) and PyTorch-style uniform bias init.
    xavier_std = jnp.sqrt(2.0 / (hidden + hashtag_size))
    weight = jax.random.normal(kw, (hashtag_size, hidden), dtype=jnp.float32) * xavier_std
    bound = 1.0 / jnp.sqrt(hidden)
    bias = jax.random.uniform(kb, (hashtag_size,), dtype=jnp.float32,
                              minval=-bound, maxval=bound)

    # Reference in plain JAX (same math as the PyTorch module).
    ref = jnp.mean(x, axis=1) @ weight.T + bias

    # One-time parameter prep (transpose + lane padding) outside the hot path.
    w_t, b2d, n_classes = prepare_nsp_params(weight, bias)

    # --- Check 1: f32 x, forced multi-tile grid, MXU-offloaded seq reduction.
    out = next_sentence_prediction(x, w_t, b2d, n_classes, tb=8, ts=8)
    out = jax.block_until_ready(out)
    assert out.shape == (batch, hashtag_size)
    assert jnp.allclose(out, ref, atol=1e-4, rtol=1e-4)

    # --- Check 2: f32 x, VPU-sum + single epilogue matmul path (large-C variant).
    out_vpu = next_sentence_prediction(x, w_t, b2d, n_classes, tb=8, ts=8,
                                       use_mxu_reduce=False)
    out_vpu = jax.block_until_ready(out_vpu)
    assert jnp.allclose(out_vpu, ref, atol=1e-4, rtol=1e-4)

    # --- Check 3: bf16 activation stream + bf16 weights (half the HBM bytes),
    # with automatic VMEM-aware tile selection.
    x_bf16 = x.astype(jnp.bfloat16)
    w_t16, b2d16, _ = prepare_nsp_params(weight, bias, weight_dtype=jnp.bfloat16)
    out16 = next_sentence_prediction(x_bf16, w_t16, b2d16, n_classes)
    out16 = jax.block_until_ready(out16)
    ref16 = (jnp.mean(x_bf16.astype(jnp.float32), axis=1)
             @ weight.astype(jnp.bfloat16).astype(jnp.float32).T + bias)
    assert out16.shape == (batch, hashtag_size)
    assert jnp.allclose(out16, ref16, atol=3e-2, rtol=3e-2)

    print("KERNEL_OK")
</pallas_src>

<mosaic_0001>
module attributes {stable_mosaic.version = 11 : i64} {
  func.func @nsp_kernel(%arg0: i32, %arg1: i32, %arg2: memref<8x8x128xf32, #tpu.memory_space<vmem>>, %arg3: memref<128x128xf32, #tpu.memory_space<vmem>>, %arg4: memref<1x128xf32, #tpu.memory_space<vmem>>, %arg5: memref<8x128xf32, #tpu.memory_space<vmem>>, %arg6: memref<8x128xf32, #tpu.memory_space<vmem>>) attributes {dimension_semantics = [#tpu.dimension_semantics<parallel>, #tpu.dimension_semantics<arbitrary>], iteration_bounds = array<i64: 2, 4>, scalar_prefetch = 0 : i64, scratch_operands = 1 : i64, tpu.core_type = #tpu.core_type<tc>, window_params = [{transform_indices = @transform_0, window_bounds = array<i64: 8, 8, 128>}, {pipeline_mode = #tpu.pipeline_mode<synchronous>, transform_indices = @transform_1, window_bounds = array<i64: 128, 128>}, {pipeline_mode = #tpu.pipeline_mode<synchronous>, transform_indices = @transform_2, window_bounds = array<i64: 1, 128>}, {transform_indices = @transform_3, window_bounds = array<i64: 8, 128>}]} {
    %c0_i32 = arith.constant 0 : i32
    %0 = arith.cmpi eq, %arg1, %c0_i32 : i32
    %1 = arith.extui %0 : i1 to i32
    %c0_i32_0 = arith.constant 0 : i32
    %2 = arith.cmpi ne, %1, %c0_i32_0 : i32
    scf.if %2 {
      %cst_11 = arith.constant 0.000000e+00 : f32
      %15 = vector.broadcast %cst_11 : f32 to vector<8x128xf32>
      %c0_12 = arith.constant 0 : index
      %c0_13 = arith.constant 0 : index
      %16 = vector.load %arg6[%c0_12, %c0_13] : memref<8x128xf32, #tpu.memory_space<vmem>>, vector<8x128xf32>
      tpu.vector_store %arg6[%c0_12, %c0_13], %15 {strides = array<i32>} : memref<8x128xf32, #tpu.memory_space<vmem>>, vector<8x128xf32>,
    } else {
    }
    %c0 = arith.constant 0 : index
    %c0_1 = arith.constant 0 : index
    %c0_2 = arith.constant 0 : index
    %3 = vector.load %arg2[%c0, %c0_1, %c0_2] : memref<8x8x128xf32, #tpu.memory_space<vmem>>, vector<8x8x128xf32>
    %4 = vector.shape_cast %3 : vector<8x8x128xf32> to vector<64x128xf32>
    %c0_3 = arith.constant 0 : index
    %c0_4 = arith.constant 0 : index
    %5 = vector.load %arg3[%c0_3, %c0_4] : memref<128x128xf32, #tpu.memory_space<vmem>>, vector<128x128xf32>
    %cst = arith.constant dense<0.000000e+00> : vector<64x128xf32>
    %6 = tpu.matmul %4, %5, %cst {dimension_numbers = #tpu.dot_dimension_numbers<[1], [0], [0], [1], [0, 0, 1, 1], [], []>} : vector<64x128xf32>, vector<128x128xf32>, vector<64x128xf32> -> vector<64x128xf32>
    %c0_5 = arith.constant 0 : index
    %c0_6 = arith.constant 0 : index
    %7 = vector.load %arg6[%c0_5, %c0_6] : memref<8x128xf32, #tpu.memory_space<vmem>>, vector<8x128xf32>
    %8 = vector.shape_cast %6 : vector<64x128xf32> to vector<8x8x128xf32>
    %cst_7 = arith.constant dense<0.000000e+00> : vector<8x128xf32>
    %9 = vector.multi_reduction <add>, %8, %cst_7 [1] : vector<8x8x128xf32> to vector<8x128xf32>
    %10 = arith.addf %7, %9 : vector<8x128xf32>
    %c0_8 = arith.constant 0 : index
    %c0_9 = arith.constant 0 : index
    %11 = vector.load %arg6[%c0_8, %c0_9] : memref<8x128xf32, #tpu.memory_space<vmem>>, vector<8x128xf32>
    tpu.vector_store %arg6[%c0_8, %c0_9], %10 {strides = array<i32>} : memref<8x128xf32, #tpu.memory_space<vmem>>, vector<8x128xf32>,
    %c3_i32 = arith.constant 3 : i32
    %12 = arith.cmpi eq, %arg1, %c3_i32 : i32
    %13 = arith.extui %12 : i1 to i32
    %c0_i32_10 = arith.constant 0 : i32
    %14 = arith.cmpi ne, %13, %c0_i32_10 : i32
    scf.if %14 {
      %c0_11 = arith.constant 0 : index
      %c0_12 = arith.constant 0 : index
      %15 = vector.load %arg6[%c0_11, %c0_12] : memref<8x128xf32, #tpu.memory_space<vmem>>, vector<8x128xf32>
      %cst_13 = arith.constant 3.125000e-02 : f32
      %16 = vector.broadcast %cst_13 : f32 to vector<8x128xf32>
      %17 = arith.mulf %15, %16 : vector<8x128xf32>
      %c0_14 = arith.constant 0 : index
      %c0_15 = arith.constant 0 : index
      %18 = vector.load %arg4[%c0_14, %c0_15] : memref<1x128xf32, #tpu.memory_space<vmem>>, vector<1x128xf32>
      %19 = vector.broadcast %18 : vector<1x128xf32> to vector<8x128xf32>
      %20 = arith.addf %17, %19 : vector<8x128xf32>
      %c0_16 = arith.constant 0 : index
      %c0_17 = arith.constant 0 : index
      %21 = vector.load %arg5[%c0_16, %c0_17] : memref<8x128xf32, #tpu.memory_space<vmem>>, vector<8x128xf32>
      tpu.vector_store %arg5[%c0_16, %c0_17], %20 {strides = array<i32>} : memref<8x128xf32, #tpu.memory_space<vmem>>, vector<8x128xf32>,
    } else {
    }
    return
  }
  func.func @transform_0(%arg0: i32, %arg1: i32) -> (i32, i32, i32) {
    %c0_i32 = arith.constant 0 : i32
    %c0_i32_0 = arith.constant 0 : i32
    return %arg0, %arg1, %c0_i32 : i32, i32, i32
  }
  func.func @transform_1(%arg0: i32, %arg1: i32) -> (i32, i32) {
    %c0_i32 = arith.constant 0 : i32
    %c0_i32_0 = arith.constant 0 : i32
    %c0_i32_1 = arith.constant 0 : i32
    return %c0_i32, %c0_i32_0 : i32, i32
  }
  func.func @transform_2(%arg0: i32, %arg1: i32) -> (i32, i32) {
    %c0_i32 = arith.constant 0 : i32
    %c0_i32_0 = arith.constant 0 : i32
    %c0_i32_1 = arith.constant 0 : i32
    return %c0_i32, %c0_i32_0 : i32, i32
  }
  func.func @transform_3(%arg0: i32, %arg1: i32) -> (i32, i32) {
    %c0_i32 = arith.constant 0 : i32
    %c0_i32_0 = arith.constant 0 : i32
    return %arg0, %c0_i32 : i32, i32
  }
}

module attributes {stable_mosaic.version = 11 : i64} {
  func.func @nsp_kernel(%arg0: i32, %arg1: i32, %arg2: memref<8x8x128xf32, #tpu.memory_space<vmem>>, %arg3: memref<128x128xf32, #tpu.memory_space<vmem>>, %arg4: memref<1x128xf32, #tpu.memory_space<vmem>>, %arg5: memref<8x128xf32, #tpu.memory_space<vmem>>, %arg6: memref<8x128xf32, #tpu.memory_space<vmem>>) attributes {dimension_semantics = [#tpu.dimension_semantics<parallel>, #tpu.dimension_semantics<arbitrary>], iteration_bounds = array<i64: 2, 4>, scalar_prefetch = 0 : i64, scratch_operands = 1 : i64, tpu.core_type = #tpu.core_type<tc>, window_params = [{transform_indices = @transform_0, window_bounds = array<i64: 8, 8, 128>}, {pipeline_mode = #tpu.pipeline_mode<synchronous>, transform_indices = @transform_1, window_bounds = array<i64: 128, 128>}, {pipeline_mode = #tpu.pipeline_mode<synchronous>, transform_indices = @transform_2, window_bounds = array<i64: 1, 128>}, {transform_indices = @transform_3, window_bounds = array<i64: 8, 128>}]} {
    %c0_i32 = arith.constant 0 : i32
    %0 = arith.cmpi eq, %arg1, %c0_i32 : i32
    %1 = arith.extui %0 : i1 to i32
    %c0_i32_0 = arith.constant 0 : i32
    %2 = arith.cmpi ne, %1, %c0_i32_0 : i32
    scf.if %2 {
      %cst_11 = arith.constant 0.000000e+00 : f32
      %15 = vector.broadcast %cst_11 : f32 to vector<8x128xf32>
      %c0_12 = arith.constant 0 : index
      %c0_13 = arith.constant 0 : index
      %16 = vector.load %arg6[%c0_12, %c0_13] : memref<8x128xf32, #tpu.memory_space<vmem>>, vector<8x128xf32>
      tpu.vector_store %arg6[%c0_12, %c0_13], %15 {strides = array<i32>} : memref<8x128xf32, #tpu.memory_space<vmem>>, vector<8x128xf32>,
    } else {
    }
    %c0 = arith.constant 0 : index
    %c0_1 = arith.constant 0 : index
    %c0_2 = arith.constant 0 : index
    %3 = vector.load %arg2[%c0, %c0_1, %c0_2] : memref<8x8x128xf32, #tpu.memory_space<vmem>>, vector<8x8x128xf32>
    %4 = vector.shape_cast %3 : vector<8x8x128xf32> to vector<64x128xf32>
    %c0_3 = arith.constant 0 : index
    %c0_4 = arith.constant 0 : index
    %5 = vector.load %arg3[%c0_3, %c0_4] : memref<128x128xf32, #tpu.memory_space<vmem>>, vector<128x128xf32>
    %cst = arith.constant dense<0.000000e+00> : vector<64x128xf32>
    %6 = tpu.matmul %4, %5, %cst {dimension_numbers = #tpu.dot_dimension_numbers<[1], [0], [0], [1], [0, 0, 1, 1], [], []>} : vector<64x128xf32>, vector<128x128xf32>, vector<64x128xf32> -> vector<64x128xf32>
    %c0_5 = arith.constant 0 : index
    %c0_6 = arith.constant 0 : index
    %7 = vector.load %arg6[%c0_5, %c0_6] : memref<8x128xf32, #tpu.memory_space<vmem>>, vector<8x128xf32>
    %8 = vector.shape_cast %6 : vector<64x128xf32> to vector<8x8x128xf32>
    %cst_7 = arith.constant dense<0.000000e+00> : vector<8x128xf32>
    %9 = vector.multi_reduction <add>, %8, %cst_7 [1] : vector<8x8x128xf32> to vector<8x128xf32>
    %10 = arith.addf %7, %9 : vector<8x128xf32>
    %c0_8 = arith.constant 0 : index
    %c0_9 = arith.constant 0 : index
    %11 = vector.load %arg6[%c0_8, %c0_9] : memref<8x128xf32, #tpu.memory_space<vmem>>, vector<8x128xf32>
    tpu.vector_store %arg6[%c0_8, %c0_9], %10 {strides = array<i32>} : memref<8x128xf32, #tpu.memory_space<vmem>>, vector<8x128xf32>,
    %c3_i32 = arith.constant 3 : i32
    %12 = arith.cmpi eq, %arg1, %c3_i32 : i32
    %13 = arith.extui %12 : i1 to i32
    %c0_i32_10 = arith.constant 0 : i32
    %14 = arith.cmpi ne, %13, %c0_i32_10 : i32
    scf.if %14 {
      %c0_11 = arith.constant 0 : index
      %c0_12 = arith.constant 0 : index
      %15 = vector.load %arg6[%c0_11, %c0_12] : memref<8x128xf32, #tpu.memory_space<vmem>>, vector<8x128xf32>
      %cst_13 = arith.constant 3.125000e-02 : f32
      %16 = vector.broadcast %cst_13 : f32 to vector<8x128xf32>
      %17 = arith.mulf %15, %16 : vector<8x128xf32>
      %c0_14 = arith.constant 0 : index
      %c0_15 = arith.constant 0 : index
      %18 = vector.load %arg4[%c0_14, %c0_15] : memref<1x128xf32, #tpu.memory_space<vmem>>, vector<1x128xf32>
      %19 = vector.broadcast %18 : vector<1x128xf32> to vector<8x128xf32>
      %20 = arith.addf %17, %19 : vector<8x128xf32>
      %c0_16 = arith.constant 0 : index
      %c0_17 = arith.constant 0 : index
      %21 = vector.load %arg5[%c0_16, %c0_17] : memref<8x128xf32, #tpu.memory_space<vmem>>, vector<8x128xf32>
      tpu.vector_store %arg5[%c0_16, %c0_17], %20 {strides = array<i32>} : memref<8x128xf32, #tpu.memory_space<vmem>>, vector<8x128xf32>,
    } else {
    }
    return
  }
  func.func @transform_0(%arg0: i32, %arg1: i32) -> (i32, i32, i32) {
    %c0_i32 = arith.constant 0 : i32
    %c0_i32_0 = arith.constant 0 : i32
    return %arg0, %arg1, %c0_i32 : i32, i32, i32
  }
  func.func @transform_1(%arg0: i32, %arg1: i32) -> (i32, i32) {
    %c0_i32 = arith.constant 0 : i32
    %c0_i32_0 = arith.constant 0 : i32
    %c0_i32_1 = arith.constant 0 : i32
    return %c0_i32, %c0_i32_0 : i32, i32
  }
  func.func @transform_2(%arg0: i32, %arg1: i32) -> (i32, i32) {
    %c0_i32 = arith.constant 0 : i32
    %c0_i32_0 = arith.constant 0 : i32
    %c0_i32_1 = arith.constant 0 : i32
    return %c0_i32, %c0_i32_0 : i32, i32
  }
  func.func @transform_3(%arg0: i32, %arg1: i32) -> (i32, i32) {
    %c0_i32 = arith.constant 0 : i32
    %c0_i32_0 = arith.constant 0 : i32
    return %arg0, %c0_i32 : i32, i32
  }
}

</mosaic_0001>

<bundles_post_ra>
// kernel: tpu_custom_call.1
= control target key start
LH: loop header
LB: loop body
LE: loop exit
PB: predicated region body
PF: predicated region fallthrough
CT: control target
= control target key end

     0   :  { %s1304_s0 = inlined_call_operand.hbm [shape: f32[16,32,128], index: 0, kind: input, shape index: {}]   ;;  %s1305_s1 = inlined_call_operand.hbm [shape: f32[128,128], index: 1, kind: input, shape index: {}]   ;;  %s1306_s2 = inlined_call_operand.vmem [shape: f32[1,128], index: 2, kind: input, shape index: {}]   ;;  %s1307_s3 = inlined_call_operand.hbm [shape: f32[16,128], index: 3, kind: output, shape index: {}]  }
   0x1   :  { %1321 = sst [smem:[#allocation17_spill]] %s1305_s1 }
   0x2   :  { %8 = vsyncpa [#allocation4], 0 }
   0x3   :  { %10 = vsyncpa [#allocation4 + $0x1], 0 }
   0x4   :  { %11 = vsyncpa [#allocation7], 0 }
   0x5   :  { %12 = vsyncpa [#allocation5], 0 }
   0x6   :  { %14 = vsyncpa [#allocation5 + $0x1], 0  ;;  %s1018_s12 = smov 0   ;;  %s1020_s13 = smov 0  }
   0x7   :  { %s1022_s14 = smov 0   ;;  %s1024_s15 = smov 0  }
   0x8   :  { %s1026_s16 = smov 0   ;;  %s1028_s17 = smov 0  }
   0x9   :  { %s1030_s18 = smov 0   ;;  %s1032_s19 = smov 0  }
   0xa   :  { %s1034_s20 = smov 0   ;;  %s1036_s21 = smov 0  }
   0xb   :  { %s1038_s22 = smov 0  }
   0xc LB: > { %1322 = sst [smem:[#allocation12_spill]] %s949_s12  ;;  %s551_s23 = sadd.s32 4294967295, %s989_s22   ;;  %s989_s22 = sphi %s1038_s22, %s20_s22   ;;  %s985_s21 = sphi %s1036_s21, %s1358_s21   ;;  %s981_s20 = sphi %s1034_s20, %s1349_s20   ;;  %s977_s19 = sphi %s1032_s19, %s1357_s19   ;;  %s973_s18 = sphi %s1030_s18, %s1348_s18   ;;  %s969_s17 = sphi %s1028_s17, %s1356_s17   ;;  %s965_s16 = sphi %s1026_s16, %s1355_s16   ;;  %s961_s15 = sphi %s1024_s15, %s1354_s15   ;;  %s957_s14 = sphi %s1022_s14, %s1353_s14   ;;  %s953_s13 = sphi %s1020_s13, %s1352_s13   ;;  %s949_s12 = sphi %s1018_s12, %s1351_s12  }
   0xd   : > { %1323 = sst [smem:[#allocation13_spill]] %s981_s20  ;;  %s552_s24 = sadd.s32 4294967294, %s989_s22  }
   0xe   : > { %p48_p0 = scmp.ne.s32.totalorder %s969_s17, %s965_s16  ;;  %p49_p1 = scmp.eq.s32.totalorder %s989_s22, 0 }
   0xf   : > { %p54_p2 = scmp.ne.s32.totalorder %s965_s16, %s961_s15  ;;  %p1078_p3 = scmp.eq.s32.totalorder %s551_s23, 0 }
  0x10   : > { %p1083_p4 = por %p49_p1, %p48_p0  ;;  %p119_p5 = scmp.ne.s32.totalorder %s957_s14, %s953_s13 }
  0x11   : > { %s1324_s26 = scalar_select %p1078_p3, 1, 0 }
  0x12   : > { %p1091_p6 = por %p1078_p3, %p54_p2  ;;  %p120_p7 = scmp.eq.s32.totalorder %s551_s23, 7 }
  0x13   : > { %p125_p8 = scmp.ne.s32.totalorder %s953_s13, %s949_s12  ;;  %p126_p9 = scmp.eq.s32.totalorder %s552_s24, 7 }
  0x14   : > { %s1326_s29 = scalar_select %p1091_p6, 1, 0 }
  0x15   : > { %p1097_p10 = por %p120_p7, %p119_p5  ;;  %p553_p11 = scmp.ge.s32.totalorder %s989_s22, 1 }
  0x16   : > { %p1102_p12 = por %p126_p9, %p125_p8  ;;  %p133_p13 = scmp.lt.s32.totalorder %s989_s22, 9 }
  0x17   : > { %s1327_s30 = scalar_select %p1097_p10, 1, 0 }
  0x18   : > { %s1328_s4 = scalar_select %p1102_p12, 1, 0 }
  0x19   : > { %p1107_p0 = pnand %p553_p11, %p133_p13  ;;  %s991_s6 = smov [#allocation6]  }
  0x1a   : > { %1329 = sst [smem:[#allocation14_spill]] %s1328_s4  ;;  %s145_s7 = sshll.u32 %s991_s6, 4  ;;  %s146_s7 = int_to_ptr.vmem [resolvable:$true] %s145_s7 }
  0x1b   : > { %s1330_s5 = scalar_select %p1107_p0, 1, 0 }
  0x1c   : > { %p696_p1 = pneg %p1107_p0  ;;  %p709_p2 = scmp.lt.s32.totalorder %s989_s22, 8 }
  0x1d   : > { %s1333_s1 = sld [smem:[#allocation17_spill]] }
  0x1e   : > { %p1116_p5 = pnand %p696_p1, %p1078_p3  ;;  %p1122_p7 = pnand %p709_p2, %p1083_p4 }
  0x20   : > { %s1332_s9 = scalar_select %p1122_p7, 1, 0 }
  0x21   : > { %p807_p9 = pneg %p1116_p5 }
  0x23   : > { %s805_s15 = scalar_lea.hbm %s1333_s1, 2048 }
  0x24   : > { %p806_p8 = scmp.ne.s32.totalorder %s1333_s1, %s805_s15  ;;  %p812_p1 = scmp.lt.u32.totalorder %s805_s15, %s1333_s1 }
  0x26   : > { %p808_p11 = pnand %p807_p9, %p806_p8 }
  0x28   : > { %p809_p13 = pneg %p808_p11 }
  0x2a   : > { %p814_p4 = pnand %p812_p1, %p809_p13 }
  0x2c   : > { %817 = shalt.err (!%p814_p4)
}
  0x2d   : > { %s818_s28 = scalar_lea.vmem %s146_s7, 2048  ;;  %p826_p3 = scmp.lt.s32.totalorder %s146_s7, %s146_s7 }
  0x2e   : > { %p819_p2 = scmp.ne.s32.totalorder %s146_s7, %s818_s28  ;;  %p827_p6 = scmp.lt.s32.totalorder %s818_s28, %s818_s28 }
  0x30   : > { %p821_p12 = pnand %p819_p2, %p807_p9  ;;  %p828_p0 = por %p827_p6, %p826_p3 }
  0x32   : > { %p822_p10 = pneg %p821_p12 }
  0x34   : > { %p829_p7 = pnand %p828_p0, %p822_p10 }
  0x36   : > { %832 = shalt.err (!%p829_p7)
}
  0x37   : > { %s1315_s10 = smov 128   ;;  %s1316_s25 = smov 8  }
  0x38   : > { %699 = dma.hbm_to_vmem [thread:$0]  (!%p1116_p5), %s1333_s1, 2048, %s146_s7, [#allocation7], %s1315_s10, %s1315_s10, %s1316_s25  }
  0x39   : > { %s29_s23 = sadd.s32 1, %s981_s20  ;;  %s32_s24 = sadd.s32 1, %s985_s21 }
  0x3a   : > { %p30_p3 = scmp.ge.s32.totalorder %s29_s23, 4  ;;  %s162_s6 = sand.u32 1, %s969_s17  }
  0x3b   : > { %s556_s28 = sshll.u32 %s162_s6, 6  ;;  %s571_s27 = sshll.u32 %s985_s21, 5 }
  0x3c   : > { %s1360_s23 = smov (%p30_p3, %s29_s23), 0  ;;  %s1362_s24 = smov (!%p30_p3, %s32_s24), %s985_s21 }
  0x3d   : > { %1334 = sst [smem:[#allocation15_spill]] %s1360_s23  ;;  %s37_s8 = ssub.s32 %s981_s20, %s1360_s23 }
  0x3e   : > { %p34_p6 = scmp.ge.s32.totalorder %s1362_s24, 2  ;;  %s172_s4 = sadd.s32 %s981_s20, %s571_s27 }
  0x3f   : > { %s166_s7 = scalar_lea.vmem [#allocation3], %s556_s28  ;;  %s559_s15 = sshll.u32 %s172_s4, 7 }
  0x40   : > { %s175_s11 = sshll.u32 %s166_s7, 4  ;;  %s1364_s24 = smov (%p34_p6, %s1362_s24), 0  ;;  %s1157_s11 = int_to_ptr.vmem [resolvable:$true] %s175_s11 }
  0x41   : > { %1335 = sst [smem:[#allocation16_spill]] %s1364_s24  ;;  %s36_s10 = ssub.s32 %s985_s21, %s1364_s24 }
  0x42   : > { %s1164_s12 = scalar_lea.hbm %s1304_s0, %s559_s15  ;;  %s38_s27 = sor.u32 %s37_s8, %s36_s10 }
  0x43   : > { %p107_p10 = scmp.eq.s32.totalorder %s36_s10, 0  ;;  %p39_p12 = scmp.eq.s32.totalorder %s38_s27, 0 }
  0x44   : > { %s1336_s28 = sadd.s32 1, %s957_s14  ;;  %s1337_s23 = sadd.s32 1, %s969_s17 }
  0x45   : > { %s1169_s7 = scalar_select %p107_p10, %s957_s14, %s1336_s28  }
  0x46   : > { %s1174_s4 = scalar_select %p39_p12, %s969_s17, %s1337_s23  }
  0x47   : > { %s1176_s20 = scalar_lea.sflag [#allocation4], %s162_s6  ;;  %s833_s24 = scalar_lea.hbm %s1164_s12, 1024 }
  0x48   : > { %p834_p0 = scmp.ne.s32.totalorder %s1164_s12, %s833_s24  ;;  %p1338_p5 = scmp.ne.s32.totalorder %s1332_s9, 0 }
  0x49   : > { %s838_s10 = scalar_lea.hbm %s1304_s0, 8192  ;;  %p839_p11 = scmp.lt.u32.totalorder %s1164_s12, %s1304_s0 }
  0x4a   : > { %p835_p7 = pneg %p1338_p5  ;;  %p840_p13 = scmp.lt.u32.totalorder %s838_s10, %s833_s24 }
  0x4b   : > { %p842_p4 = scmp.lt.u32.totalorder %s833_s24, %s1164_s12 }
  0x4c   : > { %p836_p8 = pnand %p835_p7, %p834_p0  ;;  %p841_p1 = por %p840_p13, %p839_p11 }
  0x4e   : > { %p837_p9 = pneg %p836_p8  ;;  %p843_p2 = por %p842_p4, %p841_p1 }
  0x50   : > { %p844_p3 = pnand %p843_p2, %p837_p9 }
  0x52   : > { %847 = shalt.err (!%p844_p3)
}
  0x53   : > { %s848_s23 = scalar_lea.vmem %s1157_s11, 1024  ;;  %s994_s6 = smov [#allocation3]  }
  0x54   : > { %p849_p6 = scmp.ne.s32.totalorder %s1157_s11, %s848_s23  ;;  %s853_s27 = sshll.u32 %s994_s6, 4  ;;  %s854_s27 = int_to_ptr.vmem [resolvable:$false] %s853_s27 }
  0x55   : > { %s855_s28 = scalar_lea.vmem %s854_s27, 2048  ;;  %p856_p0 = scmp.lt.s32.totalorder %s1157_s11, %s854_s27 }
  0x56   : > { %p851_p10 = pnand %p849_p6, %p835_p7  ;;  %p857_p8 = scmp.lt.s32.totalorder %s855_s28, %s848_s23 }
  0x58   : > { %p852_p12 = pneg %p851_p10  ;;  %p858_p11 = por %p857_p8, %p856_p0 }
  0x5a   : > { %p859_p13 = pnand %p858_p11, %p852_p12 }
  0x5c   : > { %862 = shalt.err (!%p859_p13)
}
  0x5d   : > { %s995_s24 = smov 512   ;;  %s1339_s1 = smov 8  }
  0x5e   : > { %s1340_s25 = smov 128   ;;  %p1341_p7 = scmp.ne.s32.totalorder %s1330_s5, 0 }
  0x5f   : > { %703 = dma.hbm_to_vmem [thread:$0]  (!%p1338_p5), %s1164_s12, 1024, %s1157_s11, %s1176_s20, %s995_s24, %s1340_s25, %s1339_s1  }
  0x60   : > { %187 = sbr.rel (%p1341_p7) target bundleno = 426 (0x1aa), region = 32  ;;  %s189_s10 = sand.u32 (!%p1341_p7), 1, %s965_s16  }
  0x61   : > { %s561_s8 = sshll.u32 (!%p1341_p7), %s189_s10, 6  ;;  %s190_s15 = scalar_lea.sflag (!%p1341_p7), [#allocation4], %s189_s10 }
  0x62   : > { %s1209_s23 = scalar_lea.vmem (!%p1341_p7), [#allocation3], %s561_s8  ;;  %p1342_p9 = scmp.ne.s32.totalorder (!%p1341_p7), %s1326_s29, 0 }
  0x67   : > { %936 = dma.done.wait (%p1342_p9), %s190_s15, 1024  }
  0x68   : > { %938 = vsyncadd (%p1342_p9), %s190_s15, 4294966272  ;;  %p1343_p1 = scmp.ne.s32.totalorder %s1324_s26, 0 }
  0x6a   : > { %940 = dma.done.wait (%p1343_p1), [#allocation7], 2048  }
  0x6b   : > { %942 = vsyncadd (%p1343_p1), [#allocation7], 4294965248  ;;  %s217_s12 = sand.u32 1, %s953_s13   ;;  %p564_p5 = scmp.ne.s32.totalorder %s973_s18, 0 }
  0x6c   : > { %s1222_s20 = sshll.u32 %s217_s12, 3  ;;  %v996_v0 = vmov (!%p564_p5), 0.0  }
  0x6d   : > { %s219_s5 = scalar_lea.vmem [#allocation8], %s1222_s20  ;;  %224 = sbr.rel (%p564_p5) target bundleno = 116 (0x74), region = 44  ;;  %225 = vst [vmem:[#allocation2] sm:$0xff] (!%p564_p5), %v996_v0 }
  0x74 PF: > { %v234_v1 = vld [vmem:[#allocation6] sm:$0xff]  ;;  %v235_v2 = vld [vmem:[#allocation6 + $0x8] sm:$0xff]  ;;  %v236_v3 = vld [vmem:[#allocation6 + $0x10] sm:$0xff]  ;;  %vm412_vm0 = vcmask 1041409   ;;  %vm414_vm1 = vcmask 1042434   ;;  %vm416_vm2 = vcmask 1043459  }
  0x75   : > { %v640_v4 = vpack.c.bf16 %v235_v2, %v234_v1  ;;  %v237_v5 = vld [vmem:[#allocation6 + $0x18] sm:$0xff]  ;;  %v238_v7 = vld [vmem:[#allocation6 + $0x20] sm:$0xff]  ;;  %v239_v8 = vld [vmem:[#allocation6 + $0x28] sm:$0xff]  ;;  %vm418_vm3 = vcmask 1044484   ;;  %vm420_vm4 = vcmask 1045509   ;;  %vm422_vm5 = vcmask 1046534  }
  0x76   : > { %v644_v6 = vpack.c.bf16 %v237_v5, %v236_v3  ;;  %v648_v9 = vpack.c.bf16 %v239_v8, %v238_v7  ;;  %v226_v10 = vld [vmem:[%s1209_s23] sm:$0xff]  ;;  %v240_v12 = vld [vmem:[#allocation6 + $0x30] sm:$0xff]  ;;  %v241_v13 = vld [vmem:[#allocation6 + $0x38] sm:$0xff]  ;;  %vm424_vm6 = vcmask 1047559   ;;  %p565_p4 = scmp.ne.s32.totalorder %s973_s18, 3 }
  0x77   : > { %641 = vmatprep.subr.bf16.mxu0 %v640_v4  ;;  %672 = vmatprep.subr.bf16.mxu1 %v640_v4  ;;  %v230_v11 = vld [vmem:[%s1209_s23 + $0x20] sm:$0xff]  ;;  %v652_v14 = vpack.c.bf16 %v241_v13, %v240_v12  ;;  %v243_v16 = vld [vmem:[#allocation6 + $0x48] sm:$0xff]  ;;  %v244_v18 = vld [vmem:[#allocation6 + $0x50] sm:$0xff] }
  0x78   : > { %643 = vmatpush3.bf16.msra.mxu0 %v640_v4  ;;  %680 = vmatpush3.bf16.msra.mxu1 %v640_v4  ;;  %v242_v15 = vld [vmem:[#allocation6 + $0x40] sm:$0xff]  ;;  %v245_v19 = vld [vmem:[#allocation6 + $0x58] sm:$0xff]  ;;  %v247_v22 = vld [vmem:[#allocation6 + $0x68] sm:$0xff] }
  0x79   : > { %645 = vmatprep.subr.bf16.mxu0 %v644_v6  ;;  %673 = vmatprep.subr.bf16.mxu1 %v644_v6  ;;  %v656_v17 = vpack.c.bf16 %v243_v16, %v242_v15  ;;  %v660_v20 = vpack.c.bf16 %v245_v19, %v244_v18  ;;  %v246_v21 = vld [vmem:[#allocation6 + $0x60] sm:$0xff]  ;;  %v248_v24 = vld [vmem:[#allocation6 + $0x70] sm:$0xff]  ;;  %v249_v25 = vld [vmem:[#allocation6 + $0x78] sm:$0xff] }
  0x7a   : > { %628 = vmatprep.mubr.f32.mxu0 %v226_v10  ;;  %634 = vmatprep.mubr.f32.mxu1 %v230_v11  ;;  %v664_v23 = vpack.c.bf16 %v247_v22, %v246_v21  ;;  %v668_v26 = vpack.c.bf16 %v249_v25, %v248_v24  ;;  %v227_v27 = vld [vmem:[%s1209_s23 + $0x8] sm:$0xff]  ;;  %v228_v29 = vld [vmem:[%s1209_s23 + $0x10] sm:$0xff]  ;;  %v229_v31 = vld [vmem:[%s1209_s23 + $0x18] sm:$0xff] }
  0x7b   : > { %v231_v28 = vld [vmem:[%s1209_s23 + $0x28] sm:$0xff]  ;;  %v232_v30 = vld [vmem:[%s1209_s23 + $0x30] sm:$0xff]  ;;  %v233_v32 = vld [vmem:[%s1209_s23 + $0x38] sm:$0xff] }
  0x7c   : > { %647 = vmatpush3.bf16.msra.mxu0 %v644_v6  ;;  %681 = vmatpush3.bf16.msra.mxu1 %v644_v6 }
  0x7d   : > { %649 = vmatprep.subr.bf16.mxu0 %v648_v9  ;;  %674 = vmatprep.subr.bf16.mxu1 %v648_v9 }
  0x80   : > { %651 = vmatpush3.bf16.msra.mxu0 %v648_v9  ;;  %682 = vmatpush3.bf16.msra.mxu1 %v648_v9 }
  0x81   : > { %653 = vmatprep.subr.bf16.mxu0 %v652_v14  ;;  %675 = vmatprep.subr.bf16.mxu1 %v652_v14 }
  0x84   : > { %655 = vmatpush3.bf16.msra.mxu0 %v652_v14  ;;  %683 = vmatpush3.bf16.msra.mxu1 %v652_v14 }
  0x85   : > { %657 = vmatprep.subr.bf16.mxu0 %v656_v17  ;;  %676 = vmatprep.subr.bf16.mxu1 %v656_v17 }
  0x88   : > { %659 = vmatpush3.bf16.msra.mxu0 %v656_v17  ;;  %684 = vmatpush3.bf16.msra.mxu1 %v656_v17 }
  0x89   : > { %661 = vmatprep.subr.bf16.mxu0 %v660_v20  ;;  %677 = vmatprep.subr.bf16.mxu1 %v660_v20 }
  0x8c   : > { %663 = vmatpush3.bf16.msra.mxu0 %v660_v20  ;;  %685 = vmatpush3.bf16.msra.mxu1 %v660_v20 }
  0x8d   : > { %665 = vmatprep.subr.bf16.mxu0 %v664_v23  ;;  %678 = vmatprep.subr.bf16.mxu1 %v664_v23 }
  0x90   : > { %667 = vmatpush3.bf16.msra.mxu0 %v664_v23  ;;  %686 = vmatpush3.bf16.msra.mxu1 %v664_v23 }
  0x91   : > { %669 = vmatprep.subr.bf16.mxu0 %v668_v26  ;;  %679 = vmatprep.subr.bf16.mxu1 %v668_v26 }
  0x94   : > { %671 = vmatpush3.bf16.msra.mxu0 %v668_v26  ;;  %687 = vmatpush3.bf16.msra.mxu1 %v668_v26 }
  0x97   : > { %629 = vmatmul.mubr.f32.vlgmr.msra.gmra.mrb[0].mxu0 %v227_v27  ;;  %635 = vmatmul.mubr.f32.vlgmr.msra.gmra.mrb[0].mxu1 %v231_v28 }
  0x98   : > { %631 = vmatprep.mubr.f32.mxu0 %v228_v29  ;;  %637 = vmatprep.mubr.f32.mxu1 %v232_v30  ;;  %v355_v29 = vld [vmem:[#allocation2] sm:$0xff] }
  0x9b   : > { %632 = vmatmul.mubr.f32.gmra.mrb[2].mxu0 %v229_v31  ;;  %638 = vmatmul.mubr.f32.gmra.mrb[2].mxu1 %v233_v32 }
 0x16a   : > { %v630_v33 = vpop.f32.mrb[0].mxu0  ;;  %v636_v34 = vpop.f32.mrb[0].mxu1 }
 0x16b   : > { %v362_v35 = vrot.slane %v630_v33, 4  ;;  %v386_v36 = vrot.slane %v636_v34, 4  ;;  %v316_v37 = vpop.f32.mrb[1].mxu0  ;;  %v336_v38 = vpop.f32.mrb[1].mxu1 }
 0x16c   : > { %v356_v39 = vrot.slane %v316_v37, 4  ;;  %v380_v40 = vrot.slane %v336_v38, 4 }
 0x16d   : > { %v363_v41 = vadd.f32 %v630_v33, %v362_v35  ;;  %v387_v42 = vadd.f32 %v636_v34, %v386_v36  ;;  %v566_v35 = vld [vmem:[%s1306_s2] ss:$0 sm:$0xff] (!%p565_p4) }
 0x16e   : > { %v357_v43 = vadd.f32 %v356_v39, %v316_v37  ;;  %v381_v44 = vadd.f32 %v380_v40, %v336_v38  ;;  %v633_v45 = vpop.f32.mrb[2].mxu0  ;;  %v639_v46 = vpop.f32.mrb[2].mxu1 }
 0x16f   : > { %v364_v47 = vrot.slane %v363_v41, 2  ;;  %v374_v48 = vrot.slane %v633_v45, 4  ;;  %v398_v49 = vrot.slane %v639_v46, 4  ;;  %v326_v50 = vpop.f32.mrb[3].mxu0  ;;  %v346_v51 = vpop.f32.mrb[3].mxu1  ;;  %v388_v57 = vrot.slane %v387_v42, 2 }
 0x170   : > { %v358_v52 = vrot.slane %v357_v43, 2  ;;  %v382_v53 = vrot.slane %v381_v44, 2  ;;  %v368_v54 = vrot.slane %v326_v50, 4  ;;  %v392_v55 = vrot.slane %v346_v51, 4 }
 0x171   : > { %v365_v56 = vadd.f32 %v364_v47, %v363_v41  ;;  %v375_v58 = vadd.f32 %v633_v45, %v374_v48  ;;  %v399_v59 = vadd.f32 %v639_v46, %v398_v49  ;;  %v389_v7 = vadd.f32 %v388_v57, %v387_v42 }
 0x172   : > { %v359_v60 = vadd.f32 %v358_v52, %v357_v43  ;;  %v369_v61 = vadd.f32 %v368_v54, %v326_v50  ;;  %v393_v62 = vadd.f32 %v392_v55, %v346_v51  ;;  %v383_v3 = vadd.f32 %v382_v53, %v381_v44 }
 0x173   : > { %v366_v63 = vrot.slane %v365_v56, 1  ;;  %v376_v0 = vrot.slane %v375_v58, 2  ;;  %v400_v1 = vrot.slane %v399_v59, 2  ;;  %v390_v17 = vrot.slane %v389_v7, 1 }
 0x174   : > { %v360_v2 = vrot.slane %v359_v60, 1  ;;  %v370_v4 = vrot.slane %v369_v61, 2  ;;  %v394_v5 = vrot.slane %v393_v62, 2  ;;  %v384_v15 = vrot.slane %v383_v3, 1 }
 0x175   : > { %v367_v6 = vadd.f32 %v366_v63, %v365_v56  ;;  %v377_v8 = vadd.f32 %v376_v0, %v375_v58  ;;  %v401_v13 = vadd.f32 %v400_v1, %v399_v59  ;;  %v391_v24 = vadd.f32 %v390_v17, %v389_v7 }
 0x176   : > { %v361_v9 = vadd.f32 %v360_v2, %v359_v60  ;;  %v371_v10 = vadd.f32 %v370_v4, %v369_v61  ;;  %v395_v11 = vadd.f32 %v394_v5, %v393_v62  ;;  %v385_v22 = vadd.f32 %v384_v15, %v383_v3 }
 0x177   : > { %v378_v12 = vrot.slane %v377_v8, 1  ;;  %v402_v21 = vrot.slane %v401_v13, 1 }
 0x178   : > { %v413_v14 = vsel %vm412_vm0, %v367_v6, %v361_v9  ;;  %v372_v16 = vrot.slane %v371_v10, 1  ;;  %v396_v19 = vrot.slane %v395_v11, 1 }
 0x179   : > { %v379_v20 = vadd.f32 %v378_v12, %v377_v8  ;;  %v403_v28 = vadd.f32 %v402_v21, %v401_v13 }
 0x17a   : > { %v373_v18 = vadd.f32 %v372_v16, %v371_v10  ;;  %v397_v26 = vadd.f32 %v396_v19, %v395_v11 }
 0x17c   : > { %v415_v23 = vsel %vm414_vm1, %v373_v18, %v413_v14 }
 0x17d   : > { %v417_v25 = vsel %vm416_vm2, %v379_v20, %v415_v23 }
 0x17e   : > { %v419_v27 = vsel %vm418_vm3, %v385_v22, %v417_v25  ;;  %432 = sbr.rel (%p565_p4) target bundleno = 401 (0x191), region = 48 }
 0x17f   : > { %v421_v30 = vsel %vm420_vm4, %v391_v24, %v419_v27 }
 0x180   : > { %v423_v31 = vsel %vm422_vm5, %v397_v26, %v421_v30 }
 0x181   : > { %v425_v32 = vsel %vm424_vm6, %v403_v28, %v423_v31 }
 0x182   : > { %v427_v33 = vadd.f32 %v425_v32, %v355_v29 }
 0x184   : > { %428 = vst [vmem:[#allocation2] sm:$0xff] %v427_v33 }
 0x18b   : > { %v433_v34 = vld [vmem:[#allocation2] sm:$0xff] }
 0x18c   : > { %v434_v36 = vmul.f32 0.03125, %v433_v34 }
 0x18e   : > { %v442_v37 = vadd.f32 %v566_v35, %v434_v36 }
 0x190   : > { %443 = vst [vmem:[%s219_s5] sm:$0xff] %v442_v37 }
 0x191 PF: > { %s568_s9 = sshll.u32 %s977_s19, 7  ;;  %s458_s27 = sshll.u32 %s219_s5, 4  ;;  %s459_s27 = int_to_ptr.vmem [resolvable:$true] %s458_s27 }
 0x192   : > { %s1244_s18 = scalar_lea.hbm %s1307_s3, %s568_s9  ;;  %s445_s28 = scalar_lea.sflag [#allocation5], %s217_s12 }
 0x193   : > { %s863_s24 = scalar_lea.vmem %s459_s27, 128  ;;  %p1344_p3 = scmp.ne.s32.totalorder %s1327_s30, 0 }
 0x194   : > { %p864_p2 = scmp.ne.s32.totalorder %s459_s27, %s863_s24  ;;  %s997_s1 = smov [#allocation8]  }
 0x195   : > { %s867_s25 = sshll.u32 %s997_s1, 4  ;;  %s868_s25 = int_to_ptr.vmem [resolvable:$false] %s867_s25 }
 0x196   : > { %p865_p6 = pnand %p864_p2, %p1344_p3  ;;  %s869_s10 = scalar_lea.vmem %s868_s25, 256 }
 0x197   : > { %p870_p12 = scmp.lt.s32.totalorder %s459_s27, %s868_s25  ;;  %p871_p0 = scmp.lt.s32.totalorder %s869_s10, %s863_s24 }
 0x198   : > { %p866_p10 = pneg %p865_p6 }
 0x199   : > { %p872_p8 = por %p871_p0, %p870_p12 }
 0x19b   : > { %p873_p11 = pnand %p872_p8, %p866_p10 }
 0x19d   : > { %876 = shalt.err (!%p873_p11)
}
 0x19e   : > { %s877_s19 = scalar_lea.hbm %s1244_s18, 128  ;;  %s881_s23 = scalar_lea.hbm %s1307_s3, 256 }
 0x19f   : > { %p878_p13 = scmp.ne.s32.totalorder %s1244_s18, %s877_s19  ;;  %p882_p1 = scmp.lt.u32.totalorder %s1244_s18, %s1307_s3 }
 0x1a0   : > { %p883_p5 = scmp.lt.u32.totalorder %s881_s23, %s877_s19  ;;  %p885_p2 = scmp.lt.u32.totalorder %s877_s19, %s1244_s18 }
 0x1a1   : > { %p879_p7 = pnand %p878_p13, %p1344_p3 }
 0x1a2   : > { %p884_p4 = por %p883_p5, %p882_p1 }
 0x1a3   : > { %p880_p9 = pneg %p879_p7 }
 0x1a4   : > { %p886_p6 = por %p885_p2, %p884_p4 }
 0x1a6   : > { %p887_p10 = pnand %p886_p6, %p880_p9 }
 0x1a8   : > { %890 = shalt.err (!%p887_p10)
}
 0x1a9   : > { %694 = dma.vmem_to_hbm [thread:$0]  (%p1344_p3), %s459_s27, 128, %s1244_s18, %s445_s28  }
 0x1aa PF: > { %s1345_s5 = sld [smem:[#allocation12_spill]]  ;;  %s1346_s26 = sld [smem:[#allocation14_spill]] }
 0x1ab   : > { %p711_p12 = scmp.ge.s32.totalorder %s989_s22, 2 }
 0x1b0   : > { %s470_s29 = sand.u32 1, %s1345_s5   ;;  %p1347_p0 = scmp.ne.s32.totalorder %s1346_s26, 0 }
 0x1b1   : > { %s471_s9 = scalar_lea.sflag [#allocation5], %s470_s29 }
 0x1b2   : > { %p705_p8 = pnand %p711_p12, %p1347_p0 }
 0x1b4   : > { %944 = dma.done.wait (!%p705_p8), %s471_s9, 128  }
 0x1b5   : > { %946 = vsyncadd (!%p705_p8), %s471_s9, 4294967168  ;;  %s20_s22 = sadd.s32 1, %s989_s22   ;;  %s1348_s18 = sld [smem:[#allocation13_spill]] }
 0x1b6   : > { %p17_p11 = scmp.ge.s32.totalorder %s20_s22, 10   ;;  %s1349_s20 = sld [smem:[#allocation15_spill]] }
 0x1b7   : > { %s1350_s30 = sld [smem:[#allocation16_spill]]  ;;  %s1351_s12 = smov %s953_s13 }
 0x1b8   : > { %s1352_s13 = smov %s957_s14  ;;  %s1353_s14 = smov %s1169_s7 }
 0x1b9   : > { %s1354_s15 = smov %s965_s16  ;;  %s1355_s16 = smov %s969_s17 }
 0x1ba   : > { %s1356_s17 = smov %s1174_s4  ;;  %s1357_s19 = smov %s985_s21 }
 0x1bb   :  { %19 = sbr.rel (!%p17_p11) target bundleno = 12 (0xc), region = 89 }
 0x1bd   : > { %s1358_s21 = smov %s1350_s30 }
 0x1c2   :  { %476 = vsyncpa [#allocation4], 1 }
 0x1c3   :  { %478 = vsyncpa [#allocation4 + $0x1], 1 }
 0x1c4   :  { %479 = vsyncpa [#allocation7], 1 }
 0x1c5   :  { %480 = vsyncpa [#allocation5], 1 }
 0x1c6   :  { %482 = vsyncpa [#allocation5 + $0x1], 1 }

// kernel: tpu_custom_call.1
= control target key start
LH: loop header
LB: loop body
LE: loop exit
PB: predicated region body
PF: predicated region fallthrough
CT: control target
= control target key end

     0   :  { %s1304_s0 = inlined_call_operand.hbm [shape: f32[16,32,128], index: 0, kind: input, shape index: {}]   ;;  %s1305_s1 = inlined_call_operand.hbm [shape: f32[128,128], index: 1, kind: input, shape index: {}]   ;;  %s1306_s2 = inlined_call_operand.vmem [shape: f32[1,128], index: 2, kind: input, shape index: {}]   ;;  %s1307_s3 = inlined_call_operand.hbm [shape: f32[16,128], index: 3, kind: output, shape index: {}]  }
   0x1   :  { %1321 = sst [smem:[#allocation17_spill]] %s1305_s1 }
   0x2   :  { %8 = vsyncpa [#allocation4], 0 }
   0x3   :  { %10 = vsyncpa [#allocation4 + $0x1], 0 }
   0x4   :  { %11 = vsyncpa [#allocation7], 0 }
   0x5   :  { %12 = vsyncpa [#allocation5], 0 }
   0x6   :  { %14 = vsyncpa [#allocation5 + $0x1], 0  ;;  %s1018_s12 = smov 0   ;;  %s1020_s13 = smov 0  }
   0x7   :  { %s1022_s14 = smov 0   ;;  %s1024_s15 = smov 0  }
   0x8   :  { %s1026_s16 = smov 0   ;;  %s1028_s17 = smov 0  }
   0x9   :  { %s1030_s18 = smov 0   ;;  %s1032_s19 = smov 0  }
   0xa   :  { %s1034_s20 = smov 0   ;;  %s1036_s21 = smov 0  }
   0xb   :  { %s1038_s22 = smov 0  }
   0xc LB: > { %1322 = sst [smem:[#allocation12_spill]] %s949_s12  ;;  %s551_s23 = sadd.s32 4294967295, %s989_s22   ;;  %s989_s22 = sphi %s1038_s22, %s20_s22   ;;  %s985_s21 = sphi %s1036_s21, %s1358_s21   ;;  %s981_s20 = sphi %s1034_s20, %s1349_s20   ;;  %s977_s19 = sphi %s1032_s19, %s1357_s19   ;;  %s973_s18 = sphi %s1030_s18, %s1348_s18   ;;  %s969_s17 = sphi %s1028_s17, %s1356_s17   ;;  %s965_s16 = sphi %s1026_s16, %s1355_s16   ;;  %s961_s15 = sphi %s1024_s15, %s1354_s15   ;;  %s957_s14 = sphi %s1022_s14, %s1353_s14   ;;  %s953_s13 = sphi %s1020_s13, %s1352_s13   ;;  %s949_s12 = sphi %s1018_s12, %s1351_s12  }
   0xd   : > { %1323 = sst [smem:[#allocation13_spill]] %s981_s20  ;;  %s552_s24 = sadd.s32 4294967294, %s989_s22  }
   0xe   : > { %p48_p0 = scmp.ne.s32.totalorder %s969_s17, %s965_s16  ;;  %p49_p1 = scmp.eq.s32.totalorder %s989_s22, 0 }
   0xf   : > { %p54_p2 = scmp.ne.s32.totalorder %s965_s16, %s961_s15  ;;  %p1078_p3 = scmp.eq.s32.totalorder %s551_s23, 0 }
  0x10   : > { %p1083_p4 = por %p49_p1, %p48_p0  ;;  %p119_p5 = scmp.ne.s32.totalorder %s957_s14, %s953_s13 }
  0x11   : > { %s1324_s26 = scalar_select %p1078_p3, 1, 0 }
  0x12   : > { %p1091_p6 = por %p1078_p3, %p54_p2  ;;  %p120_p7 = scmp.eq.s32.totalorder %s551_s23, 7 }
  0x13   : > { %p125_p8 = scmp.ne.s32.totalorder %s953_s13, %s949_s12  ;;  %p126_p9 = scmp.eq.s32.totalorder %s552_s24, 7 }
  0x14   : > { %s1326_s29 = scalar_select %p1091_p6, 1, 0 }
  0x15   : > { %p1097_p10 = por %p120_p7, %p119_p5  ;;  %p553_p11 = scmp.ge.s32.totalorder %s989_s22, 1 }
  0x16   : > { %p1102_p12 = por %p126_p9, %p125_p8  ;;  %p133_p13 = scmp.lt.s32.totalorder %s989_s22, 9 }
  0x17   : > { %s1327_s30 = scalar_select %p1097_p10, 1, 0 }
  0x18   : > { %s1328_s4 = scalar_select %p1102_p12, 1, 0 }
  0x19   : > { %p1107_p0 = pnand %p553_p11, %p133_p13  ;;  %s991_s6 = smov [#allocation6]  }
  0x1a   : > { %1329 = sst [smem:[#allocation14_spill]] %s1328_s4  ;;  %s145_s7 = sshll.u32 %s991_s6, 4  ;;  %s146_s7 = int_to_ptr.vmem [resolvable:$true] %s145_s7 }
  0x1b   : > { %s1330_s5 = scalar_select %p1107_p0, 1, 0 }
  0x1c   : > { %p696_p1 = pneg %p1107_p0  ;;  %p709_p2 = scmp.lt.s32.totalorder %s989_s22, 8 }
  0x1d   : > { %s1333_s1 = sld [smem:[#allocation17_spill]] }
  0x1e   : > { %p1116_p5 = pnand %p696_p1, %p1078_p3  ;;  %p1122_p7 = pnand %p709_p2, %p1083_p4 }
  0x20   : > { %s1332_s9 = scalar_select %p1122_p7, 1, 0 }
  0x21   : > { %p807_p9 = pneg %p1116_p5 }
  0x23   : > { %s805_s15 = scalar_lea.hbm %s1333_s1, 2048 }
  0x24   : > { %p806_p8 = scmp.ne.s32.totalorder %s1333_s1, %s805_s15  ;;  %p812_p1 = scmp.lt.u32.totalorder %s805_s15, %s1333_s1 }
  0x26   : > { %p808_p11 = pnand %p807_p9, %p806_p8 }
  0x28   : > { %p809_p13 = pneg %p808_p11 }
  0x2a   : > { %p814_p4 = pnand %p812_p1, %p809_p13 }
  0x2c   : > { %817 = shalt.err (!%p814_p4)
}
  0x2d   : > { %s818_s28 = scalar_lea.vmem %s146_s7, 2048  ;;  %p826_p3 = scmp.lt.s32.totalorder %s146_s7, %s146_s7 }
  0x2e   : > { %p819_p2 = scmp.ne.s32.totalorder %s146_s7, %s818_s28  ;;  %p827_p6 = scmp.lt.s32.totalorder %s818_s28, %s818_s28 }
  0x30   : > { %p821_p12 = pnand %p819_p2, %p807_p9  ;;  %p828_p0 = por %p827_p6, %p826_p3 }
  0x32   : > { %p822_p10 = pneg %p821_p12 }
  0x34   : > { %p829_p7 = pnand %p828_p0, %p822_p10 }
  0x36   : > { %832 = shalt.err (!%p829_p7)
}
  0x37   : > { %s1315_s10 = smov 128   ;;  %s1316_s25 = smov 8  }
  0x38   : > { %699 = dma.hbm_to_vmem [thread:$0]  (!%p1116_p5), %s1333_s1, 2048, %s146_s7, [#allocation7], %s1315_s10, %s1315_s10, %s1316_s25  }
  0x39   : > { %s29_s23 = sadd.s32 1, %s981_s20  ;;  %s32_s24 = sadd.s32 1, %s985_s21 }
  0x3a   : > { %p30_p3 = scmp.ge.s32.totalorder %s29_s23, 4  ;;  %s162_s6 = sand.u32 1, %s969_s17  }
  0x3b   : > { %s556_s28 = sshll.u32 %s162_s6, 6  ;;  %s571_s27 = sshll.u32 %s985_s21, 5 }
  0x3c   : > { %s1360_s23 = smov (%p30_p3, %s29_s23), 0  ;;  %s1362_s24 = smov (!%p30_p3, %s32_s24), %s985_s21 }
  0x3d   : > { %1334 = sst [smem:[#allocation15_spill]] %s1360_s23  ;;  %s37_s8 = ssub.s32 %s981_s20, %s1360_s23 }
  0x3e   : > { %p34_p6 = scmp.ge.s32.totalorder %s1362_s24, 2  ;;  %s172_s4 = sadd.s32 %s981_s20, %s571_s27 }
  0x3f   : > { %s166_s7 = scalar_lea.vmem [#allocation3], %s556_s28  ;;  %s559_s15 = sshll.u32 %s172_s4, 7 }
  0x40   : > { %s175_s11 = sshll.u32 %s166_s7, 4  ;;  %s1364_s24 = smov (%p34_p6, %s1362_s24), 0  ;;  %s1157_s11 = int_to_ptr.vmem [resolvable:$true] %s175_s11 }
  0x41   : > { %1335 = sst [smem:[#allocation16_spill]] %s1364_s24  ;;  %s36_s10 = ssub.s32 %s985_s21, %s1364_s24 }
  0x42   : > { %s1164_s12 = scalar_lea.hbm %s1304_s0, %s559_s15  ;;  %s38_s27 = sor.u32 %s37_s8, %s36_s10 }
  0x43   : > { %p107_p10 = scmp.eq.s32.totalorder %s36_s10, 0  ;;  %p39_p12 = scmp.eq.s32.totalorder %s38_s27, 0 }
  0x44   : > { %s1336_s28 = sadd.s32 1, %s957_s14  ;;  %s1337_s23 = sadd.s32 1, %s969_s17 }
  0x45   : > { %s1169_s7 = scalar_select %p107_p10, %s957_s14, %s1336_s28  }
  0x46   : > { %s1174_s4 = scalar_select %p39_p12, %s969_s17, %s1337_s23  }
  0x47   : > { %s1176_s20 = scalar_lea.sflag [#allocation4], %s162_s6  ;;  %s833_s24 = scalar_lea.hbm %s1164_s12, 1024 }
  0x48   : > { %p834_p0 = scmp.ne.s32.totalorder %s1164_s12, %s833_s24  ;;  %p1338_p5 = scmp.ne.s32.totalorder %s1332_s9, 0 }
  0x49   : > { %s838_s10 = scalar_lea.hbm %s1304_s0, 8192  ;;  %p839_p11 = scmp.lt.u32.totalorder %s1164_s12, %s1304_s0 }
  0x4a   : > { %p835_p7 = pneg %p1338_p5  ;;  %p840_p13 = scmp.lt.u32.totalorder %s838_s10, %s833_s24 }
  0x4b   : > { %p842_p4 = scmp.lt.u32.totalorder %s833_s24, %s1164_s12 }
  0x4c   : > { %p836_p8 = pnand %p835_p7, %p834_p0  ;;  %p841_p1 = por %p840_p13, %p839_p11 }
  0x4e   : > { %p837_p9 = pneg %p836_p8  ;;  %p843_p2 = por %p842_p4, %p841_p1 }
  0x50   : > { %p844_p3 = pnand %p843_p2, %p837_p9 }
  0x52   : > { %847 = shalt.err (!%p844_p3)
}
  0x53   : > { %s848_s23 = scalar_lea.vmem %s1157_s11, 1024  ;;  %s994_s6 = smov [#allocation3]  }
  0x54   : > { %p849_p6 = scmp.ne.s32.totalorder %s1157_s11, %s848_s23  ;;  %s853_s27 = sshll.u32 %s994_s6, 4  ;;  %s854_s27 = int_to_ptr.vmem [resolvable:$false] %s853_s27 }
  0x55   : > { %s855_s28 = scalar_lea.vmem %s854_s27, 2048  ;;  %p856_p0 = scmp.lt.s32.totalorder %s1157_s11, %s854_s27 }
  0x56   : > { %p851_p10 = pnand %p849_p6, %p835_p7  ;;  %p857_p8 = scmp.lt.s32.totalorder %s855_s28, %s848_s23 }
  0x58   : > { %p852_p12 = pneg %p851_p10  ;;  %p858_p11 = por %p857_p8, %p856_p0 }
  0x5a   : > { %p859_p13 = pnand %p858_p11, %p852_p12 }
  0x5c   : > { %862 = shalt.err (!%p859_p13)
}
  0x5d   : > { %s995_s24 = smov 512   ;;  %s1339_s1 = smov 8  }
  0x5e   : > { %s1340_s25 = smov 128   ;;  %p1341_p7 = scmp.ne.s32.totalorder %s1330_s5, 0 }
  0x5f   : > { %703 = dma.hbm_to_vmem [thread:$0]  (!%p1338_p5), %s1164_s12, 1024, %s1157_s11, %s1176_s20, %s995_s24, %s1340_s25, %s1339_s1  }
  0x60   : > { %187 = sbr.rel (%p1341_p7) target bundleno = 426 (0x1aa), region = 32  ;;  %s189_s10 = sand.u32 (!%p1341_p7), 1, %s965_s16  }
  0x61   : > { %s561_s8 = sshll.u32 (!%p1341_p7), %s189_s10, 6  ;;  %s190_s15 = scalar_lea.sflag (!%p1341_p7), [#allocation4], %s189_s10 }
  0x62   : > { %s1209_s23 = scalar_lea.vmem (!%p1341_p7), [#allocation3], %s561_s8  ;;  %p1342_p9 = scmp.ne.s32.totalorder (!%p1341_p7), %s1326_s29, 0 }
  0x67   : > { %936 = dma.done.wait (%p1342_p9), %s190_s15, 1024  }
  0x68   : > { %938 = vsyncadd (%p1342_p9), %s190_s15, 4294966272  ;;  %p1343_p1 = scmp.ne.s32.totalorder %s1324_s26, 0 }
  0x6a   : > { %940 = dma.done.wait (%p1343_p1), [#allocation7], 2048  }
  0x6b   : > { %942 = vsyncadd (%p1343_p1), [#allocation7], 4294965248  ;;  %s217_s12 = sand.u32 1, %s953_s13   ;;  %p564_p5 = scmp.ne.s32.totalorder %s973_s18, 0 }
  0x6c   : > { %s1222_s20 = sshll.u32 %s217_s12, 3  ;;  %v996_v0 = vmov (!%p564_p5), 0.0  }
  0x6d   : > { %s219_s5 = scalar_lea.vmem [#allocation8], %s1222_s20  ;;  %224 = sbr.rel (%p564_p5) target bundleno = 116 (0x74), region = 44  ;;  %225 = vst [vmem:[#allocation2] sm:$0xff] (!%p564_p5), %v996_v0 }
  0x74 PF: > { %v234_v1 = vld [vmem:[#allocation6] sm:$0xff]  ;;  %v235_v2 = vld [vmem:[#allocation6 + $0x8] sm:$0xff]  ;;  %v236_v3 = vld [vmem:[#allocation6 + $0x10] sm:$0xff]  ;;  %vm412_vm0 = vcmask 1041409   ;;  %vm414_vm1 = vcmask 1042434   ;;  %vm416_vm2 = vcmask 1043459  }
  0x75   : > { %v640_v4 = vpack.c.bf16 %v235_v2, %v234_v1  ;;  %v237_v5 = vld [vmem:[#allocation6 + $0x18] sm:$0xff]  ;;  %v238_v7 = vld [vmem:[#allocation6 + $0x20] sm:$0xff]  ;;  %v239_v8 = vld [vmem:[#allocation6 + $0x28] sm:$0xff]  ;;  %vm418_vm3 = vcmask 1044484   ;;  %vm420_vm4 = vcmask 1045509   ;;  %vm422_vm5 = vcmask 1046534  }
  0x76   : > { %v644_v6 = vpack.c.bf16 %v237_v5, %v236_v3  ;;  %v648_v9 = vpack.c.bf16 %v239_v8, %v238_v7  ;;  %v226_v10 = vld [vmem:[%s1209_s23] sm:$0xff]  ;;  %v240_v12 = vld [vmem:[#allocation6 + $0x30] sm:$0xff]  ;;  %v241_v13 = vld [vmem:[#allocation6 + $0x38] sm:$0xff]  ;;  %vm424_vm6 = vcmask 1047559   ;;  %p565_p4 = scmp.ne.s32.totalorder %s973_s18, 3 }
  0x77   : > { %641 = vmatprep.subr.bf16.mxu0 %v640_v4  ;;  %672 = vmatprep.subr.bf16.mxu1 %v640_v4  ;;  %v230_v11 = vld [vmem:[%s1209_s23 + $0x20] sm:$0xff]  ;;  %v652_v14 = vpack.c.bf16 %v241_v13, %v240_v12  ;;  %v243_v16 = vld [vmem:[#allocation6 + $0x48] sm:$0xff]  ;;  %v244_v18 = vld [vmem:[#allocation6 + $0x50] sm:$0xff] }
  0x78   : > { %643 = vmatpush3.bf16.msra.mxu0 %v640_v4  ;;  %680 = vmatpush3.bf16.msra.mxu1 %v640_v4  ;;  %v242_v15 = vld [vmem:[#allocation6 + $0x40] sm:$0xff]  ;;  %v245_v19 = vld [vmem:[#allocation6 + $0x58] sm:$0xff]  ;;  %v247_v22 = vld [vmem:[#allocation6 + $0x68] sm:$0xff] }
  0x79   : > { %645 = vmatprep.subr.bf16.mxu0 %v644_v6  ;;  %673 = vmatprep.subr.bf16.mxu1 %v644_v6  ;;  %v656_v17 = vpack.c.bf16 %v243_v16, %v242_v15  ;;  %v660_v20 = vpack.c.bf16 %v245_v19, %v244_v18  ;;  %v246_v21 = vld [vmem:[#allocation6 + $0x60] sm:$0xff]  ;;  %v248_v24 = vld [vmem:[#allocation6 + $0x70] sm:$0xff]  ;;  %v249_v25 = vld [vmem:[#allocation6 + $0x78] sm:$0xff] }
  0x7a   : > { %628 = vmatprep.mubr.f32.mxu0 %v226_v10  ;;  %634 = vmatprep.mubr.f32.mxu1 %v230_v11  ;;  %v664_v23 = vpack.c.bf16 %v247_v22, %v246_v21  ;;  %v668_v26 = vpack.c.bf16 %v249_v25, %v248_v24  ;;  %v227_v27 = vld [vmem:[%s1209_s23 + $0x8] sm:$0xff]  ;;  %v228_v29 = vld [vmem:[%s1209_s23 + $0x10] sm:$0xff]  ;;  %v229_v31 = vld [vmem:[%s1209_s23 + $0x18] sm:$0xff] }
  0x7b   : > { %v231_v28 = vld [vmem:[%s1209_s23 + $0x28] sm:$0xff]  ;;  %v232_v30 = vld [vmem:[%s1209_s23 + $0x30] sm:$0xff]  ;;  %v233_v32 = vld [vmem:[%s1209_s23 + $0x38] sm:$0xff] }
  0x7c   : > { %647 = vmatpush3.bf16.msra.mxu0 %v644_v6  ;;  %681 = vmatpush3.bf16.msra.mxu1 %v644_v6 }
  0x7d   : > { %649 = vmatprep.subr.bf16.mxu0 %v648_v9  ;;  %674 = vmatprep.subr.bf16.mxu1 %v648_v9 }
  0x80   : > { %651 = vmatpush3.bf16.msra.mxu0 %v648_v9  ;;  %682 = vmatpush3.bf16.msra.mxu1 %v648_v9 }
  0x81   : > { %653 = vmatprep.subr.bf16.mxu0 %v652_v14  ;;  %675 = vmatprep.subr.bf16.mxu1 %v652_v14 }
  0x84   : > { %655 = vmatpush3.bf16.msra.mxu0 %v652_v14  ;;  %683 = vmatpush3.bf16.msra.mxu1 %v652_v14 }
  0x85   : > { %657 = vmatprep.subr.bf16.mxu0 %v656_v17  ;;  %676 = vmatprep.subr.bf16.mxu1 %v656_v17 }
  0x88   : > { %659 = vmatpush3.bf16.msra.mxu0 %v656_v17  ;;  %684 = vmatpush3.bf16.msra.mxu1 %v656_v17 }
  0x89   : > { %661 = vmatprep.subr.bf16.mxu0 %v660_v20  ;;  %677 = vmatprep.subr.bf16.mxu1 %v660_v20 }
  0x8c   : > { %663 = vmatpush3.bf16.msra.mxu0 %v660_v20  ;;  %685 = vmatpush3.bf16.msra.mxu1 %v660_v20 }
  0x8d   : > { %665 = vmatprep.subr.bf16.mxu0 %v664_v23  ;;  %678 = vmatprep.subr.bf16.mxu1 %v664_v23 }
  0x90   : > { %667 = vmatpush3.bf16.msra.mxu0 %v664_v23  ;;  %686 = vmatpush3.bf16.msra.mxu1 %v664_v23 }
  0x91   : > { %669 = vmatprep.subr.bf16.mxu0 %v668_v26  ;;  %679 = vmatprep.subr.bf16.mxu1 %v668_v26 }
  0x94   : > { %671 = vmatpush3.bf16.msra.mxu0 %v668_v26  ;;  %687 = vmatpush3.bf16.msra.mxu1 %v668_v26 }
  0x97   : > { %629 = vmatmul.mubr.f32.vlgmr.msra.gmra.mrb[0].mxu0 %v227_v27  ;;  %635 = vmatmul.mubr.f32.vlgmr.msra.gmra.mrb[0].mxu1 %v231_v28 }
  0x98   : > { %631 = vmatprep.mubr.f32.mxu0 %v228_v29  ;;  %637 = vmatprep.mubr.f32.mxu1 %v232_v30  ;;  %v355_v29 = vld [vmem:[#allocation2] sm:$0xff] }
  0x9b   : > { %632 = vmatmul.mubr.f32.gmra.mrb[2].mxu0 %v229_v31  ;;  %638 = vmatmul.mubr.f32.gmra.mrb[2].mxu1 %v233_v32 }
 0x16a   : > { %v630_v33 = vpop.f32.mrb[0].mxu0  ;;  %v636_v34 = vpop.f32.mrb[0].mxu1 }
 0x16b   : > { %v362_v35 = vrot.slane %v630_v33, 4  ;;  %v386_v36 = vrot.slane %v636_v34, 4  ;;  %v316_v37 = vpop.f32.mrb[1].mxu0  ;;  %v336_v38 = vpop.f32.mrb[1].mxu1 }
 0x16c   : > { %v356_v39 = vrot.slane %v316_v37, 4  ;;  %v380_v40 = vrot.slane %v336_v38, 4 }
 0x16d   : > { %v363_v41 = vadd.f32 %v630_v33, %v362_v35  ;;  %v387_v42 = vadd.f32 %v636_v34, %v386_v36  ;;  %v566_v35 = vld [vmem:[%s1306_s2] ss:$0 sm:$0xff] (!%p565_p4) }
 0x16e   : > { %v357_v43 = vadd.f32 %v356_v39, %v316_v37  ;;  %v381_v44 = vadd.f32 %v380_v40, %v336_v38  ;;  %v633_v45 = vpop.f32.mrb[2].mxu0  ;;  %v639_v46 = vpop.f32.mrb[2].mxu1 }
 0x16f   : > { %v364_v47 = vrot.slane %v363_v41, 2  ;;  %v374_v48 = vrot.slane %v633_v45, 4  ;;  %v398_v49 = vrot.slane %v639_v46, 4  ;;  %v326_v50 = vpop.f32.mrb[3].mxu0  ;;  %v346_v51 = vpop.f32.mrb[3].mxu1  ;;  %v388_v57 = vrot.slane %v387_v42, 2 }
 0x170   : > { %v358_v52 = vrot.slane %v357_v43, 2  ;;  %v382_v53 = vrot.slane %v381_v44, 2  ;;  %v368_v54 = vrot.slane %v326_v50, 4  ;;  %v392_v55 = vrot.slane %v346_v51, 4 }
 0x171   : > { %v365_v56 = vadd.f32 %v364_v47, %v363_v41  ;;  %v375_v58 = vadd.f32 %v633_v45, %v374_v48  ;;  %v399_v59 = vadd.f32 %v639_v46, %v398_v49  ;;  %v389_v7 = vadd.f32 %v388_v57, %v387_v42 }
 0x172   : > { %v359_v60 = vadd.f32 %v358_v52, %v357_v43  ;;  %v369_v61 = vadd.f32 %v368_v54, %v326_v50  ;;  %v393_v62 = vadd.f32 %v392_v55, %v346_v51  ;;  %v383_v3 = vadd.f32 %v382_v53, %v381_v44 }
 0x173   : > { %v366_v63 = vrot.slane %v365_v56, 1  ;;  %v376_v0 = vrot.slane %v375_v58, 2  ;;  %v400_v1 = vrot.slane %v399_v59, 2  ;;  %v390_v17 = vrot.slane %v389_v7, 1 }
 0x174   : > { %v360_v2 = vrot.slane %v359_v60, 1  ;;  %v370_v4 = vrot.slane %v369_v61, 2  ;;  %v394_v5 = vrot.slane %v393_v62, 2  ;;  %v384_v15 = vrot.slane %v383_v3, 1 }
 0x175   : > { %v367_v6 = vadd.f32 %v366_v63, %v365_v56  ;;  %v377_v8 = vadd.f32 %v376_v0, %v375_v58  ;;  %v401_v13 = vadd.f32 %v400_v1, %v399_v59  ;;  %v391_v24 = vadd.f32 %v390_v17, %v389_v7 }
 0x176   : > { %v361_v9 = vadd.f32 %v360_v2, %v359_v60  ;;  %v371_v10 = vadd.f32 %v370_v4, %v369_v61  ;;  %v395_v11 = vadd.f32 %v394_v5, %v393_v62  ;;  %v385_v22 = vadd.f32 %v384_v15, %v383_v3 }
 0x177   : > { %v378_v12 = vrot.slane %v377_v8, 1  ;;  %v402_v21 = vrot.slane %v401_v13, 1 }
 0x178   : > { %v413_v14 = vsel %vm412_vm0, %v367_v6, %v361_v9  ;;  %v372_v16 = vrot.slane %v371_v10, 1  ;;  %v396_v19 = vrot.slane %v395_v11, 1 }
 0x179   : > { %v379_v20 = vadd.f32 %v378_v12, %v377_v8  ;;  %v403_v28 = vadd.f32 %v402_v21, %v401_v13 }
 0x17a   : > { %v373_v18 = vadd.f32 %v372_v16, %v371_v10  ;;  %v397_v26 = vadd.f32 %v396_v19, %v395_v11 }
 0x17c   : > { %v415_v23 = vsel %vm414_vm1, %v373_v18, %v413_v14 }
 0x17d   : > { %v417_v25 = vsel %vm416_vm2, %v379_v20, %v415_v23 }
 0x17e   : > { %v419_v27 = vsel %vm418_vm3, %v385_v22, %v417_v25  ;;  %432 = sbr.rel (%p565_p4) target bundleno = 401 (0x191), region = 48 }
 0x17f   : > { %v421_v30 = vsel %vm420_vm4, %v391_v24, %v419_v27 }
 0x180   : > { %v423_v31 = vsel %vm422_vm5, %v397_v26, %v421_v30 }
 0x181   : > { %v425_v32 = vsel %vm424_vm6, %v403_v28, %v423_v31 }
 0x182   : > { %v427_v33 = vadd.f32 %v425_v32, %v355_v29 }
 0x184   : > { %428 = vst [vmem:[#allocation2] sm:$0xff] %v427_v33 }
 0x18b   : > { %v433_v34 = vld [vmem:[#allocation2] sm:$0xff] }
 0x18c   : > { %v434_v36 = vmul.f32 0.03125, %v433_v34 }
 0x18e   : > { %v442_v37 = vadd.f32 %v566_v35, %v434_v36 }
 0x190   : > { %443 = vst [vmem:[%s219_s5] sm:$0xff] %v442_v37 }
 0x191 PF: > { %s568_s9 = sshll.u32 %s977_s19, 7  ;;  %s458_s27 = sshll.u32 %s219_s5, 4  ;;  %s459_s27 = int_to_ptr.vmem [resolvable:$true] %s458_s27 }
 0x192   : > { %s1244_s18 = scalar_lea.hbm %s1307_s3, %s568_s9  ;;  %s445_s28 = scalar_lea.sflag [#allocation5], %s217_s12 }
 0x193   : > { %s863_s24 = scalar_lea.vmem %s459_s27, 128  ;;  %p1344_p3 = scmp.ne.s32.totalorder %s1327_s30, 0 }
 0x194   : > { %p864_p2 = scmp.ne.s32.totalorder %s459_s27, %s863_s24  ;;  %s997_s1 = smov [#allocation8]  }
 0x195   : > { %s867_s25 = sshll.u32 %s997_s1, 4  ;;  %s868_s25 = int_to_ptr.vmem [resolvable:$false] %s867_s25 }
 0x196   : > { %p865_p6 = pnand %p864_p2, %p1344_p3  ;;  %s869_s10 = scalar_lea.vmem %s868_s25, 256 }
 0x197   : > { %p870_p12 = scmp.lt.s32.totalorder %s459_s27, %s868_s25  ;;  %p871_p0 = scmp.lt.s32.totalorder %s869_s10, %s863_s24 }
 0x198   : > { %p866_p10 = pneg %p865_p6 }
 0x199   : > { %p872_p8 = por %p871_p0, %p870_p12 }
 0x19b   : > { %p873_p11 = pnand %p872_p8, %p866_p10 }
 0x19d   : > { %876 = shalt.err (!%p873_p11)
}
 0x19e   : > { %s877_s19 = scalar_lea.hbm %s1244_s18, 128  ;;  %s881_s23 = scalar_lea.hbm %s1307_s3, 256 }
 0x19f   : > { %p878_p13 = scmp.ne.s32.totalorder %s1244_s18, %s877_s19  ;;  %p882_p1 = scmp.lt.u32.totalorder %s1244_s18, %s1307_s3 }
 0x1a0   : > { %p883_p5 = scmp.lt.u32.totalorder %s881_s23, %s877_s19  ;;  %p885_p2 = scmp.lt.u32.totalorder %s877_s19, %s1244_s18 }
 0x1a1   : > { %p879_p7 = pnand %p878_p13, %p1344_p3 }
 0x1a2   : > { %p884_p4 = por %p883_p5, %p882_p1 }
 0x1a3   : > { %p880_p9 = pneg %p879_p7 }
 0x1a4   : > { %p886_p6 = por %p885_p2, %p884_p4 }
 0x1a6   : > { %p887_p10 = pnand %p886_p6, %p880_p9 }
 0x1a8   : > { %890 = shalt.err (!%p887_p10)
}
 0x1a9   : > { %694 = dma.vmem_to_hbm [thread:$0]  (%p1344_p3), %s459_s27, 128, %s1244_s18, %s445_s28  }
 0x1aa PF: > { %s1345_s5 = sld [smem:[#allocation12_spill]]  ;;  %s1346_s26 = sld [smem:[#allocation14_spill]] }
 0x1ab   : > { %p711_p12 = scmp.ge.s32.totalorder %s989_s22, 2 }
 0x1b0   : > { %s470_s29 = sand.u32 1, %s1345_s5   ;;  %p1347_p0 = scmp.ne.s32.totalorder %s1346_s26, 0 }
 0x1b1   : > { %s471_s9 = scalar_lea.sflag [#allocation5], %s470_s29 }
 0x1b2   : > { %p705_p8 = pnand %p711_p12, %p1347_p0 }
 0x1b4   : > { %944 = dma.done.wait (!%p705_p8), %s471_s9, 128  }
 0x1b5   : > { %946 = vsyncadd (!%p705_p8), %s471_s9, 4294967168  ;;  %s20_s22 = sadd.s32 1, %s989_s22   ;;  %s1348_s18 = sld [smem:[#allocation13_spill]] }
 0x1b6   : > { %p17_p11 = scmp.ge.s32.totalorder %s20_s22, 10   ;;  %s1349_s20 = sld [smem:[#allocation15_spill]] }
 0x1b7   : > { %s1350_s30 = sld [smem:[#allocation16_spill]]  ;;  %s1351_s12 = smov %s953_s13 }
 0x1b8   : > { %s1352_s13 = smov %s957_s14  ;;  %s1353_s14 = smov %s1169_s7 }
 0x1b9   : > { %s1354_s15 = smov %s965_s16  ;;  %s1355_s16 = smov %s969_s17 }
 0x1ba   : > { %s1356_s17 = smov %s1174_s4  ;;  %s1357_s19 = smov %s985_s21 }
 0x1bb   :  { %19 = sbr.rel (!%p17_p11) target bundleno = 12 (0xc), region = 89 }
 0x1bd   : > { %s1358_s21 = smov %s1350_s30 }
 0x1c2   :  { %476 = vsyncpa [#allocation4], 1 }
 0x1c3   :  { %478 = vsyncpa [#allocation4 + $0x1], 1 }
 0x1c4   :  { %479 = vsyncpa [#allocation7], 1 }
 0x1c5   :  { %480 = vsyncpa [#allocation5], 1 }
 0x1c6   :  { %482 = vsyncpa [#allocation5 + $0x1], 1 }

</bundles_post_ra>
